<compile_context>
chip_gen: v7x
topology: tpu7x:2x2x1
jax: 0.10.0
libtpu: 0.0.40
codegen_flags: <defaults>
</compile_context>

<pallas_src>
import functools
import math

import jax
import jax.numpy as jnp
from jax.experimental import pallas as pl
from jax.experimental.pallas import tpu as pltpu

ALPHA = 0.8
CE_RATIO = 0.5
EPS = 1e-7
_LOG_EPS = math.log(EPS)
_LOG_1M_EPS = math.log1p(-EPS)
_LANES = 128
_SUBLANES = 8


def _combo_partial_kernel(x_ref, t_ref, o_ref, *, cr, n_chunks, apply_sigmoid,
                          use_mxu_fold):
    """Accumulate partial sums into o_ref[0, k]: k=0 intersection, k=1 sum(p)+sum(t),
    k=2 unscaled weighted-BCE sum."""
    @pl.when(pl.program_id(1) == 0)
    def _():
        o_ref[...] = jnp.zeros_like(o_ref)

    if use_mxu_fold:
        # (cr,128)->(8,128) column sums on the (idle) MXU.  Weights are 1/8 so
        # each sublane row holds total/8; the wrapper's sublane sum recovers the
        # exact total (summing 8 identical f32 values is exact).
        fold_w = jnp.full((_SUBLANES, cr), 0.125, dtype=jnp.float32)

        def fold(v):
            return jnp.dot(fold_w, v, preferred_element_type=jnp.float32)
    else:
        # Tile-aligned sublane fold: pure cross-vreg VALU adds (no XLU).
        def fold(v):
            return v.reshape(cr // _SUBLANES, _SUBLANES, _LANES).sum(axis=0)

    c1 = jnp.float32(1.0 - ALPHA)

    @pl.loop(0, n_chunks)
    def _(j):
        r0 = pl.multiple_of(j * cr, cr)
        x = x_ref[pl.ds(r0, cr), :].astype(jnp.float32)
        t = t_ref[pl.ds(r0, cr), :].astype(jnp.float32)

        if apply_sigmoid:
            # p = sigmoid(x); log p = x - softplus(x); log(1-p) = -softplus(x).
            # One exp + one (EUP) recip + one log1p per element.
            e = jnp.exp(-jnp.abs(x))
            d = 1.0 + e
            r = pl.reciprocal(d, approx=True)       # EUP slot
            inv = r * (2.0 - d * r)                 # one Newton step -> f32 accuracy
            p = jnp.where(x >= 0, inv, e * inv)
            sp = jnp.maximum(x, 0.0) + jnp.log1p(e)
            # Clipped log-probs reproduce the reference clamp(p, eps, 1-eps).
            log_p = jnp.clip(x - sp, _LOG_EPS, _LOG_1M_EPS)
            log_1mp = jnp.clip(-sp, _LOG_EPS, _LOG_1M_EPS)
        else:
            p = x
            pc = jnp.clip(p, EPS, 1.0 - EPS)
            log_p = jnp.log(pc)
            log_1mp = jnp.log(1.0 - pc)

        # Unscaled BCE:  t*log p + (1-A)*(1-t)*log(1-p)
        #            ==  t*(log p - (1-A)*log(1-p)) + (1-A)*log(1-p)
        # The constant -(ALPHA * ...) and the /n are applied in the wrapper.
        cl = c1 * log_1mp
        s = t * (log_p - cl) + cl

        o_ref[0, 0] += fold(p * t)    # intersection
        o_ref[0, 1] += fold(p + t)    # dice only needs sum(p) + sum(t)
        o_ref[0, 2] += fold(s)        # unscaled weighted-BCE sum


def combo_loss(inputs, targets, smooth=1.0, sigmoid=True, *,
               tm=8192, chunk_rows=1024, num_cores=1, stream_dtype=None):
    """JAX/Pallas equivalent of MyComboLoss.forward. Returns a scalar f32.

    num_cores: set to 2 on v7x (2 TensorCores) to shard the leading grid axis
      with CORE_PARALLEL; keep 1 on v5e/v6e.
    stream_dtype: e.g. jnp.bfloat16 to halve HBM traffic on HBM-bound chips
      (accumulation stays f32 in the kernel).
    """
    x = inputs.reshape(-1)
    t = targets.reshape(-1)
    if stream_dtype is not None:
        x = x.astype(stream_dtype)
        t = t.astype(stream_dtype)
    elif not jnp.issubdtype(t.dtype, jnp.floating):
        t = t.astype(jnp.float32)
    n = x.shape[0]

    rows_total = n // _LANES
    rows8 = (rows_total // _SUBLANES) * _SUBLANES

    inter = jnp.float32(0.0)
    spt = jnp.float32(0.0)     # sum(p) + sum(t)
    s_sum = jnp.float32(0.0)   # unscaled weighted-BCE sum
    rows_kernel = 0

    if rows8 >= _SUBLANES:
        x_item = jnp.dtype(x.dtype).itemsize
        t_item = jnp.dtype(t.dtype).itemsize
        # Cap the block so double-buffered inputs stay <= 32 MiB (v7x has 64 MiB VMEM).
        bytes_per_row_pair = 2 * _LANES * (x_item + t_item)
        cap_rows = max(_SUBLANES, (32 << 20) // bytes_per_row_pair)

        cr = min(chunk_rows, tm, rows8, cap_rows)
        cr = max(_SUBLANES, (cr // _SUBLANES) * _SUBLANES)
        tm_eff = min(tm, rows8, cap_rows)
        tm_eff = max(cr, (tm_eff // cr) * cr)

        row_blocks = rows8 // tm_eff
        nc = max(1, min(int(num_cores), row_blocks))
        row_blocks_k = (row_blocks // nc) * nc        # exact coverage: no clamping/masking
        steps = row_blocks_k // nc
        rows_kernel = row_blocks_k * tm_eff
        n_chunks = tm_eff // cr
        use_mxu_fold = cr >= _LANES

        xk = x[: rows_kernel * _LANES].reshape(rows_kernel, _LANES)
        tk = t[: rows_kernel * _LANES].reshape(rows_kernel, _LANES)

        kernel = functools.partial(
            _combo_partial_kernel,
            cr=cr, n_chunks=n_chunks,
            apply_sigmoid=bool(sigmoid),
            use_mxu_fold=use_mxu_fold,
        )

        # VMEM budget: double-buffered I/O blocks + per-chunk intermediates + slack.
        io_bytes = 2 * tm_eff * _LANES * (x_item + t_item)
        out_bytes = 2 * 3 * _SUBLANES * _LANES * 4
        inter_bytes = 12 * cr * _LANES * 4 + _SUBLANES * cr * 4
        vmem_limit = int(max(16 << 20,
                             min(56 << 20, io_bytes + out_bytes + inter_bytes + (4 << 20))))

        lead_sem = pltpu.CORE_PARALLEL if nc > 1 else pltpu.ARBITRARY

        def in_map(c, i):
            return (c * steps + i, 0)

        partials = pl.pallas_call(
            kernel,
            out_shape=jax.ShapeDtypeStruct((nc, 3, _SUBLANES, _LANES), jnp.float32),
            grid_spec=pltpu.PrefetchScalarGridSpec(
                num_scalar_prefetch=0,
                grid=(nc, steps),
                in_specs=[
                    pl.BlockSpec((tm_eff, _LANES), in_map),
                    pl.BlockSpec((tm_eff, _LANES), in_map),
                ],
                out_specs=pl.BlockSpec((1, 3, _SUBLANES, _LANES),
                                       lambda c, i: (c, 0, 0, 0)),
            ),
            compiler_params=pltpu.CompilerParams(
                dimension_semantics=(lead_sem, pltpu.ARBITRARY),
                vmem_limit_bytes=vmem_limit,
            ),
        )(xk, tk)

        sums = jnp.sum(partials, axis=(0, 2, 3))      # (3,)
        inter = sums[0]
        spt = sums[1]
        s_sum = sums[2]

    # Ragged tail (< one block, often empty): reduced with plain fused XLA ops.
    rem = n - rows_kernel * _LANES
    if rem > 0:
        xr = x[rows_kernel * _LANES:].astype(jnp.float32)
        tr = t[rows_kernel * _LANES:].astype(jnp.float32)
        pr = jax.nn.sigmoid(xr) if sigmoid else xr
        inter = inter + jnp.sum(pr * tr)
        spt = spt + jnp.sum(pr) + jnp.sum(tr)
        pc = jnp.clip(pr, EPS, 1.0 - EPS)
        s_sum = s_sum + jnp.sum(tr * jnp.log(pc) +
                                (1.0 - ALPHA) * (1.0 - tr) * jnp.log(1.0 - pc))

    dice = (2.0 * inter + smooth) / (spt + smooth)
    weighted_ce = (-ALPHA) * s_sum / jnp.float32(n)
    return CE_RATIO * weighted_ce - (1.0 - CE_RATIO) * dice


def _reference_combo_loss(inputs, targets, smooth=1.0, sigmoid=True):
    x = jax.nn.sigmoid(inputs).reshape(-1) if sigmoid else inputs.reshape(-1)
    t = targets.reshape(-1).astype(jnp.float32)
    intersection = jnp.sum(x * t)
    dice = (2.0 * intersection + smooth) / (jnp.sum(x) + jnp.sum(t) + smooth)
    xc = jnp.clip(x, EPS, 1.0 - EPS)
    out = -(ALPHA * (t * jnp.log(xc) + (1.0 - ALPHA) * (1.0 - t) * jnp.log(1.0 - xc)))
    weighted_ce = jnp.mean(out)
    return CE_RATIO * weighted_ce - (1.0 - CE_RATIO) * dice


if __name__ == "__main__":
    # MyComboLoss has no learnable parameters; only inputs (logits) and targets.
    key = jax.random.PRNGKey(0)
    k1, k2, k3, k4 = jax.random.split(key, 4)

    loss_fn = jax.jit(functools.partial(combo_loss, smooth=1.0, sigmoid=True))

    # Case 1: small NCHW feature map (sublane-fold path, exact tiling).
    shape1 = (2, 4, 16, 16)
    x1 = jax.random.normal(k1, shape1, dtype=jnp.float32)               # logits
    t1 = (jax.random.uniform(k2, shape1) > 0.5).astype(jnp.float32)     # binary mask
    out1 = jax.block_until_ready(loss_fn(x1, t1))
    ref1 = _reference_combo_loss(x1, t1)
    assert jnp.allclose(out1, ref1, atol=1e-5, rtol=1e-5), (out1, ref1)

    # Case 2: larger map -> exercises the MXU-fold path.
    shape2 = (2, 4, 64, 64)
    x2 = jax.random.normal(k3, shape2, dtype=jnp.float32)
    t2 = (jax.random.uniform(k4, shape2) > 0.5).astype(jnp.float32)
    out2 = jax.block_until_ready(loss_fn(x2, t2))
    ref2 = _reference_combo_loss(x2, t2)
    assert jnp.allclose(out2, ref2, atol=1e-5, rtol=1e-5), (out2, ref2)

    # Case 3: ragged size -> kernel handles the exactly-covered bulk, wrapper the tail.
    shape3 = (3, 5, 17, 19)
    x3 = jax.random.normal(k1, shape3, dtype=jnp.float32)
    t3 = (jax.random.uniform(k2, shape3) > 0.5).astype(jnp.float32)
    out3 = jax.block_until_ready(loss_fn(x3, t3))
    ref3 = _reference_combo_loss(x3, t3)
    assert jnp.allclose(out3, ref3, atol=1e-5, rtol=1e-5), (out3, ref3)

    print("KERNEL_OK")
</pallas_src>

<mosaic_0001>
module attributes {stable_mosaic.version = 11 : i64} {
  func.func @_combo_partial_kernel(%arg0: i32, %arg1: i32, %arg2: memref<16x128xf32, #tpu.memory_space<vmem>>, %arg3: memref<16x128xf32, #tpu.memory_space<vmem>>, %arg4: memref<1x3x8x128xf32, #tpu.memory_space<vmem>>) attributes {dimension_semantics = [#tpu.dimension_semantics<arbitrary>, #tpu.dimension_semantics<arbitrary>], iteration_bounds = array<i64: 1, 1>, scalar_prefetch = 0 : i64, scratch_operands = 0 : i64, tpu.core_type = #tpu.core_type<tc>, window_params = [{transform_indices = @transform_0, window_bounds = array<i64: 16, 128>}, {transform_indices = @transform_1, window_bounds = array<i64: 16, 128>}, {transform_indices = @transform_2, window_bounds = array<i64: 1, 3, 8, 128>}]} {
    %c0_i32 = arith.constant 0 : i32
    %0 = arith.cmpi eq, %arg1, %c0_i32 : i32
    %1 = arith.extui %0 : i1 to i32
    %c0_i32_0 = arith.constant 0 : i32
    %2 = arith.cmpi ne, %1, %c0_i32_0 : i32
    scf.if %2 {
      %cst_40 = arith.constant 0.000000e+00 : f32
      %72 = vector.broadcast %cst_40 : f32 to vector<1x3x8x128xf32>
      %c0_41 = arith.constant 0 : index
      %c0_42 = arith.constant 0 : index
      %c0_43 = arith.constant 0 : index
      %c0_44 = arith.constant 0 : index
      %73 = vector.load %arg4[%c0_41, %c0_42, %c0_43, %c0_44] : memref<1x3x8x128xf32, #tpu.memory_space<vmem>>, vector<1x3x8x128xf32>
      tpu.vector_store %arg4[%c0_41, %c0_42, %c0_43, %c0_44], %72 {strides = array<i32>} : memref<1x3x8x128xf32, #tpu.memory_space<vmem>>, vector<1x3x8x128xf32>,
    } else {
    }
    %cst = arith.constant 2.000000e-01 : f32
    %c0_i32_1 = arith.constant 0 : i32
    %c1_i32 = arith.constant 1 : i32
    %3 = arith.muli %c0_i32_1, %c1_i32 : i32
    %c0_i32_2 = arith.constant 0 : i32
    %4 = arith.addi %c0_i32_2, %3 : i32
    %c16_i32 = arith.constant 16 : i32
    %5 = arith.muli %4, %c16_i32 : i32
    %6 = tpu.assume_multiple %5, 16 : i32
    %7 = arith.index_cast %6 : i32 to index
    %c0 = arith.constant 0 : index
    %8 = vector.load %arg2[%7, %c0] : memref<16x128xf32, #tpu.memory_space<vmem>>, vector<16x128xf32>
    %9 = arith.index_cast %6 : i32 to index
    %c0_3 = arith.constant 0 : index
    %10 = vector.load %arg3[%9, %c0_3] : memref<16x128xf32, #tpu.memory_space<vmem>>, vector<16x128xf32>
    %11 = math.absf %8 : vector<16x128xf32>
    %cst_4 = arith.constant 0.000000e+00 : f32
    %12 = vector.broadcast %cst_4 : f32 to vector<16x128xf32>
    %13 = arith.subf %12, %11 : vector<16x128xf32>
    %14 = math.exp %13 : vector<16x128xf32>
    %cst_5 = arith.constant 1.000000e+00 : f32
    %15 = vector.broadcast %cst_5 : f32 to vector<16x128xf32>
    %16 = arith.addf %15, %14 : vector<16x128xf32>
    %17 = tpu.reciprocal %16 {approx = true} : vector<16x128xf32> -> vector<16x128xf32>
    %18 = arith.mulf %16, %17 : vector<16x128xf32>
    %cst_6 = arith.constant 2.000000e+00 : f32
    %19 = vector.broadcast %cst_6 : f32 to vector<16x128xf32>
    %20 = arith.subf %19, %18 : vector<16x128xf32>
    %21 = arith.mulf %17, %20 : vector<16x128xf32>
    %cst_7 = arith.constant 0.000000e+00 : f32
    %22 = vector.broadcast %cst_7 : f32 to vector<16x128xf32>
    %23 = arith.cmpf oge, %8, %22 : vector<16x128xf32>
    %24 = arith.mulf %14, %21 : vector<16x128xf32>
    %25 = arith.select %23, %21, %24 : vector<16x128xi1>, vector<16x128xf32>
    %cst_8 = arith.constant 0.000000e+00 : f32
    %26 = vector.broadcast %cst_8 : f32 to vector<16x128xf32>
    %27 = arith.maximumf %8, %26 : vector<16x128xf32>
    %28 = math.log1p %14 : vector<16x128xf32>
    %29 = arith.addf %27, %28 : vector<16x128xf32>
    %30 = arith.subf %8, %29 : vector<16x128xf32>
    %cst_9 = arith.constant -16.1180954 : f32
    %cst_10 = arith.constant -1.00000008E-7 : f32
    %31 = vector.broadcast %cst_9 : f32 to vector<16x128xf32>
    %32 = arith.maximumf %31, %30 : vector<16x128xf32>
    %33 = vector.broadcast %cst_10 : f32 to vector<16x128xf32>
    %34 = arith.minimumf %33, %32 : vector<16x128xf32>
    %cst_11 = arith.constant 0.000000e+00 : f32
    %35 = vector.broadcast %cst_11 : f32 to vector<16x128xf32>
    %36 = arith.subf %35, %29 : vector<16x128xf32>
    %cst_12 = arith.constant -16.1180954 : f32
    %cst_13 = arith.constant -1.00000008E-7 : f32
    %37 = vector.broadcast %cst_12 : f32 to vector<16x128xf32>
    %38 = arith.maximumf %37, %36 : vector<16x128xf32>
    %39 = vector.broadcast %cst_13 : f32 to vector<16x128xf32>
    %40 = arith.minimumf %39, %38 : vector<16x128xf32>
    %41 = vector.broadcast %cst : f32 to vector<16x128xf32>
    %42 = arith.mulf %41, %40 : vector<16x128xf32>
    %43 = arith.subf %34, %42 : vector<16x128xf32>
    %44 = arith.mulf %10, %43 : vector<16x128xf32>
    %45 = arith.addf %44, %42 : vector<16x128xf32>
    %c0_14 = arith.constant 0 : index
    %c0_15 = arith.constant 0 : index
    %c0_16 = arith.constant 0 : index
    %c0_17 = arith.constant 0 : index
    %46 = vector.load %arg4[%c0_14, %c0_15, %c0_16, %c0_17] : memref<1x3x8x128xf32, #tpu.memory_space<vmem>>, vector<1x1x8x128xf32>
    %47 = vector.shape_cast %46 : vector<1x1x8x128xf32> to vector<8x128xf32>
    %48 = arith.mulf %25, %10 : vector<16x128xf32>
    %49 = vector.shape_cast %48 : vector<16x128xf32> to vector<2x8x128xf32>
    %cst_18 = arith.constant dense<0.000000e+00> : vector<8x128xf32>
    %50 = vector.multi_reduction <add>, %49, %cst_18 [0] : vector<2x8x128xf32> to vector<8x128xf32>
    %51 = arith.addf %47, %50 : vector<8x128xf32>
    %c0_19 = arith.constant 0 : index
    %c0_20 = arith.constant 0 : index
    %c0_21 = arith.constant 0 : index
    %c0_22 = arith.constant 0 : index
    %52 = vector.load %arg4[%c0_19, %c0_20, %c0_21, %c0_22] : memref<1x3x8x128xf32, #tpu.memory_space<vmem>>, vector<1x1x8x128xf32>
    %53 = vector.shape_cast %52 : vector<1x1x8x128xf32> to vector<8x128xf32>
    %54 = vector.shape_cast %51 : vector<8x128xf32> to vector<1x1x8x128xf32>
    tpu.vector_store %arg4[%c0_19, %c0_20, %c0_21, %c0_22], %54 {strides = array<i32>} : memref<1x3x8x128xf32, #tpu.memory_space<vmem>>, vector<1x1x8x128xf32>,
    %c0_23 = arith.constant 0 : index
    %c1 = arith.constant 1 : index
    %c0_24 = arith.constant 0 : index
    %c0_25 = arith.constant 0 : index
    %55 = vector.load %arg4[%c0_23, %c1, %c0_24, %c0_25] : memref<1x3x8x128xf32, #tpu.memory_space<vmem>>, vector<1x1x8x128xf32>
    %56 = vector.shape_cast %55 : vector<1x1x8x128xf32> to vector<8x128xf32>
    %57 = arith.addf %25, %10 : vector<16x128xf32>
    %58 = vector.shape_cast %57 : vector<16x128xf32> to vector<2x8x128xf32>
    %cst_26 = arith.constant dense<0.000000e+00> : vector<8x128xf32>
    %59 = vector.multi_reduction <add>, %58, %cst_26 [0] : vector<2x8x128xf32> to vector<8x128xf32>
    %60 = arith.addf %56, %59 : vector<8x128xf32>
    %c0_27 = arith.constant 0 : index
    %c1_28 = arith.constant 1 : index
    %c0_29 = arith.constant 0 : index
    %c0_30 = arith.constant 0 : index
    %61 = vector.load %arg4[%c0_27, %c1_28, %c0_29, %c0_30] : memref<1x3x8x128xf32, #tpu.memory_space<vmem>>, vector<1x1x8x128xf32>
    %62 = vector.shape_cast %61 : vector<1x1x8x128xf32> to vector<8x128xf32>
    %63 = vector.shape_cast %60 : vector<8x128xf32> to vector<1x1x8x128xf32>
    tpu.vector_store %arg4[%c0_27, %c1_28, %c0_29, %c0_30], %63 {strides = array<i32>} : memref<1x3x8x128xf32, #tpu.memory_space<vmem>>, vector<1x1x8x128xf32>,
    %c0_31 = arith.constant 0 : index
    %c2 = arith.constant 2 : index
    %c0_32 = arith.constant 0 : index
    %c0_33 = arith.constant 0 : index
    %64 = vector.load %arg4[%c0_31, %c2, %c0_32, %c0_33] : memref<1x3x8x128xf32, #tpu.memory_space<vmem>>, vector<1x1x8x128xf32>
    %65 = vector.shape_cast %64 : vector<1x1x8x128xf32> to vector<8x128xf32>
    %66 = vector.shape_cast %45 : vector<16x128xf32> to vector<2x8x128xf32>
    %cst_34 = arith.constant dense<0.000000e+00> : vector<8x128xf32>
    %67 = vector.multi_reduction <add>, %66, %cst_34 [0] : vector<2x8x128xf32> to vector<8x128xf32>
    %68 = arith.addf %65, %67 : vector<8x128xf32>
    %c0_35 = arith.constant 0 : index
    %c2_36 = arith.constant 2 : index
    %c0_37 = arith.constant 0 : index
    %c0_38 = arith.constant 0 : index
    %69 = vector.load %arg4[%c0_35, %c2_36, %c0_37, %c0_38] : memref<1x3x8x128xf32, #tpu.memory_space<vmem>>, vector<1x1x8x128xf32>
    %70 = vector.shape_cast %69 : vector<1x1x8x128xf32> to vector<8x128xf32>
    %71 = vector.shape_cast %68 : vector<8x128xf32> to vector<1x1x8x128xf32>
    tpu.vector_store %arg4[%c0_35, %c2_36, %c0_37, %c0_38], %71 {strides = array<i32>} : memref<1x3x8x128xf32, #tpu.memory_space<vmem>>, vector<1x1x8x128xf32>,
    %c1_i32_39 = arith.constant 1 : i32
    return
  }
  func.func @transform_0(%arg0: i32, %arg1: i32) -> (i32, i32) {
    %c1_i32 = arith.constant 1 : i32
    %0 = arith.muli %arg0, %c1_i32 : i32
    %1 = arith.addi %0, %arg1 : i32
    %c0_i32 = arith.constant 0 : i32
    %c0_i32_0 = arith.constant 0 : i32
    return %1, %c0_i32 : i32, i32
  }
  func.func @transform_1(%arg0: i32, %arg1: i32) -> (i32, i32) {
    %c1_i32 = arith.constant 1 : i32
    %0 = arith.muli %arg0, %c1_i32 : i32
    %1 = arith.addi %0, %arg1 : i32
    %c0_i32 = arith.constant 0 : i32
    %c0_i32_0 = arith.constant 0 : i32
    return %1, %c0_i32 : i32, i32
  }
  func.func @transform_2(%arg0: i32, %arg1: i32) -> (i32, i32, i32, i32) {
    %c0_i32 = arith.constant 0 : i32
    %c0_i32_0 = arith.constant 0 : i32
    %c0_i32_1 = arith.constant 0 : i32
    %c0_i32_2 = arith.constant 0 : i32
    return %arg0, %c0_i32, %c0_i32_0, %c0_i32_1 : i32, i32, i32, i32
  }
}

</mosaic_0001>

<bundles_post_ra>
// kernel: combo_loss.1
= control target key start
LH: loop header
LB: loop body
LE: loop exit
PB: predicated region body
PF: predicated region fallthrough
CT: control target
= control target key end

     0   :  { %s225_s0 = inlined_call_operand.vmem [shape: f32[16,128], index: 0, kind: input, shape index: {}]   ;;  %s226_s1 = inlined_call_operand.vmem [shape: f32[16,128], index: 1, kind: input, shape index: {}]   ;;  %s227_s2 = inlined_call_operand.vmem [shape: f32[1,3,8,128], index: 2, kind: output, shape index: {}]  }
   0x1   :  { %v62_v0 = vld [vmem:[%s225_s0] sm:$0xff]  ;;  %v204_v1 = vld [vmem:[%s225_s0 + $0x8] sm:$0xff] }
   0x2   :  { %v66_v2 = vand.u32 2147483647, %v62_v0  ;;  %v67_v3 = vand.u32 2147483647, %v204_v1  ;;  %v90_v24 = vmax.f32 %v62_v0, 0.0  ;;  %v91_v28 = vmax.f32 %v204_v1, 0.0 }
   0x3   :  { %vm84_vm2 = vcmp.ge.f32.partialorder %v62_v0, 0.0  ;;  %vm85_vm3 = vcmp.ge.f32.partialorder %v204_v1, 0.0  ;;  %v64_v42 = vld [vmem:[%s226_s1] sm:$0xff]  ;;  %v65_v46 = vld [vmem:[%s226_s1 + $0x8] sm:$0xff] }
   0x4   :  { %v68_v4 = vsub.f32 0.0, %v66_v2  ;;  %v69_v5 = vsub.f32 0.0, %v67_v3 }
   0x6   :  { %v70_v6 = vmul.f32 1.442695, %v68_v4  ;;  %v72_v7 = vmul.f32 1.442695, %v69_v5 }
   0x8   :  { %171 = vpow2.f32 %v70_v6 }
   0x9   :  { %173 = vpow2.f32 %v72_v7 }
  0x12   :  { %v172_v8 = vpop.eup %171 }
  0x13   :  { %v174_v9 = vpop.eup %173  ;;  %v74_v10 = vadd.f32 1.0, %v172_v8  ;;  %v95_v12 = vmul.f32 -0.5, %v172_v8  ;;  %v98_v15 = vand.u32 2147483647, %v172_v8 }
  0x14   :  { %v75_v11 = vadd.f32 1.0, %v174_v9  ;;  %v104_v13 = vmul.f32 -0.5, %v174_v9  ;;  %v107_v17 = vand.u32 2147483647, %v174_v9 }
  0x15   :  { %175 = vrcp.f32 %v74_v10  ;;  %v96_v14 = vadd.f32 1.0, %v95_v12  ;;  %vm99_vm0 = vcmp.lt.f32.partialorder %v98_v15, 0.0004427343 }
  0x16   :  { %177 = vrcp.f32 %v75_v11  ;;  %v105_v16 = vadd.f32 1.0, %v104_v13  ;;  %vm108_vm1 = vcmp.lt.f32.partialorder %v107_v17, 0.0004427343 }
  0x17   :  { %179 = vlog2.f32 %v74_v10  ;;  %v97_v21 = vmul.f32 %v172_v8, %v96_v14 }
  0x18   :  { %181 = vlog2.f32 %v75_v11  ;;  %v106_v25 = vmul.f32 %v174_v9, %v105_v16 }
  0x1f   :  { %v176_v18 = vpop.eup %175 }
  0x20   :  { %v178_v19 = vpop.eup %177  ;;  %v78_v20 = vmul.f32 %v176_v18, %v74_v10 }
  0x21   :  { %v180_v22 = vpop.eup %179  ;;  %v79_v23 = vmul.f32 %v178_v19, %v75_v11 }
  0x22   :  { %v182_v26 = vpop.eup %181  ;;  %v80_v27 = vsub.f32 2.0, %v78_v20  ;;  %v94_v29 = vmul.f32 0.6931472, %v180_v22 }
  0x23   :  { %v81_v30 = vsub.f32 2.0, %v79_v23  ;;  %v103_v31 = vmul.f32 0.6931472, %v182_v26 }
  0x24   :  { %v82_v32 = vmul.f32 %v176_v18, %v80_v27  ;;  %v100_v33 = vsel %vm99_vm0, %v97_v21, %v94_v29 }
  0x25   :  { %v83_v34 = vmul.f32 %v178_v19, %v81_v30  ;;  %v109_v35 = vsel %vm108_vm1, %v106_v25, %v103_v31  ;;  %v110_v36 = vadd.f32 %v100_v33, %v90_v24 }
  0x26   :  { %v86_v37 = vmul.f32 %v172_v8, %v82_v32  ;;  %v111_v38 = vadd.f32 %v109_v35, %v91_v28 }
  0x27   :  { %v87_v39 = vmul.f32 %v174_v9, %v83_v34  ;;  %v112_v40 = vsub.f32 %v62_v0, %v110_v36  ;;  %v118_v41 = vsub.f32 0.0, %v110_v36 }
  0x28   :  { %v88_v43 = vsel %vm84_vm2, %v82_v32, %v86_v37  ;;  %v113_v44 = vsub.f32 %v204_v1, %v111_v38  ;;  %v119_v45 = vsub.f32 0.0, %v111_v38 }
  0x29   :  { %v89_v47 = vsel %vm85_vm3, %v83_v34, %v87_v39  ;;  %v133_v48 = vmul.f32 %v88_v43, %v64_v42  ;;  %v140_v49 = vadd.f32 %v88_v43, %v64_v42  ;;  %v114_v50 = vmax.f32 %v112_v40, -16.118095 }
  0x2a   :  { %v134_v51 = vmul.f32 %v89_v47, %v65_v46  ;;  %v141_v52 = vadd.f32 %v89_v47, %v65_v46  ;;  %v115_v53 = vmax.f32 %v113_v44, -16.118095  ;;  %v120_v54 = vmax.f32 %v118_v41, -16.118095 }
  0x2b   :  { %v121_v55 = vmax.f32 %v119_v45, -16.118095  ;;  %v116_v58 = vmin.f32 %v114_v50, -1.0000001e-07 }
  0x2c   :  { %v135_v56 = vadd.f32 %v134_v51, %v133_v48  ;;  %v142_v57 = vadd.f32 %v141_v52, %v140_v49  ;;  %v122_v59 = vmin.f32 %v120_v54, -1.0000001e-07  ;;  %v117_v60 = vmin.f32 %v115_v53, -1.0000001e-07 }
  0x2d   :  { %v123_v61 = vmin.f32 %v121_v55, -1.0000001e-07 }
  0x2e   :  { %v124_v62 = vmul.f32 0.2, %v122_v59  ;;  %137 = vst [vmem:[%s227_s2] sm:$0xff] %v135_v56  ;;  %167 = vst [vmem:[%s227_s2 + $0x8] sm:$0xff] %v142_v57 }
  0x2f   :  { %v125_v63 = vmul.f32 0.2, %v123_v61 }
  0x30   :  { %v126_v0 = vsub.f32 %v116_v58, %v124_v62 }
  0x31   :  { %v127_v1 = vsub.f32 %v117_v60, %v125_v63 }
  0x32   :  { %v128_v2 = vmul.f32 %v126_v0, %v64_v42 }
  0x33   :  { %v129_v3 = vmul.f32 %v127_v1, %v65_v46 }
  0x34   :  { %v130_v4 = vadd.f32 %v128_v2, %v124_v62 }
  0x35   :  { %v131_v5 = vadd.f32 %v129_v3, %v125_v63 }
  0x37   :  { %v147_v6 = vadd.f32 %v131_v5, %v130_v4 }
  0x39   :  { %169 = vst [vmem:[%s227_s2 + $0x10] sm:$0xff] %v147_v6 }

</bundles_post_ra>
